<compile_context>
chip_gen: v5e
topology: v5e:2x2
jax: 0.10.0
libtpu: 0.0.40
codegen_flags: <defaults>
</compile_context>

<pallas_src>
from typing import NamedTuple

import jax
import jax.numpy as jnp
from jax import lax
from jax.experimental import pallas as pl
from jax.experimental.pallas import tpu as pltpu

_LANE = 128      # lane width (last dim)
_SUBLANE = 8     # sublane width (second-to-last dim)


def _round_up(x, m):
    return ((x + m - 1) // m) * m


class EncoderParams(NamedTuple):
    weights: tuple          # padded weights; last layer stored transposed if out_dim == 1
    biases: tuple           # (1, pdout) rows, float32
    in_dim: int
    out_dim: int
    transposed_out: bool    # True iff out_dim == 1 (lane-dense transposed output path)


def prepare_encoder_params(weights, biases, *, compute_dtype=jnp.float32,
                           lane_multiple=_LANE):
    """Pad / transpose parameters ONCE (hoisted out of the per-call forward).

    Args:
      weights: list of (in_dim_i, out_dim_i) float32 matrices (already W^T).
      biases:  list of (out_dim_i,) float32 vectors.
      compute_dtype: dtype for the matmul operands (f32 default; bf16 optional,
        slightly different numerics, f32 accumulation either way).
      lane_multiple: hidden-dim padding granularity (128; use 256 on v6e/v7x
        for genuinely wide hidden layers >= ~224 to fill the 256x256 MXU).
    """
    num_layers = len(weights)
    in_dim = int(weights[0].shape[0])
    out_dim = int(weights[-1].shape[1])
    transposed_out = (out_dim == 1)

    # Padded widths: keep in_dim unpadded (x is not feature-padded); pad hidden
    # widths to lane multiples; out_dim==1 stays 1 (transposed row output).
    dims = [in_dim] + [int(w.shape[1]) for w in weights]
    pdims = [in_dim] + [_round_up(d, lane_multiple) for d in dims[1:-1]]
    pdims.append(1 if transposed_out else _round_up(out_dim, _LANE))

    pw, pb = [], []
    for i, (w, b) in enumerate(zip(weights, biases)):
        din, dout = int(w.shape[0]), int(w.shape[1])
        pdin, pdout = pdims[i], pdims[i + 1]
        is_last = (i == num_layers - 1)
        if is_last and transposed_out:
            # Store the final (K, 1) column as a lane-dense (1, K_pad) row.
            w_t = (jnp.zeros((1, pdin), compute_dtype)
                   .at[0, :din].set(w[:, 0].astype(compute_dtype)))
            b_p = jnp.asarray(b, jnp.float32).reshape(1, 1)
            pw.append(w_t)
            pb.append(b_p)
        else:
            if (pdin, pdout) != (din, dout):
                w_p = (jnp.zeros((pdin, pdout), compute_dtype)
                       .at[:din, :dout].set(w.astype(compute_dtype)))
            else:
                w_p = jnp.asarray(w, compute_dtype)
            b_p = jnp.zeros((1, pdout), jnp.float32).at[0, :dout].set(b)
            pw.append(w_p)
            pb.append(b_p)

    return EncoderParams(tuple(pw), tuple(pb), in_dim, out_dim, transposed_out)


def _make_mlp_kernel(num_layers, transposed_out):
    """Kernel over refs: (x, w0, b0, ..., w_{L-1}, b_{L-1}, out)."""

    def kernel(*refs):
        x_ref, o_ref = refs[0], refs[-1]
        wb = refs[1:-1]

        h = x_ref[...]
        # All layers except the last: Linear + ReLU (f32 accumulation).
        for layer in range(num_layers - 1):
            w = wb[2 * layer][...]
            b = wb[2 * layer + 1][...]
            h = jnp.dot(h.astype(w.dtype), w,
                        preferred_element_type=jnp.float32) + b
            h = jnp.maximum(h, 0.0)

        w = wb[-2][...]
        b = wb[-1][...]
        if transposed_out:
            # w is a lane-dense (1, K) row; contract against h (tile, K) to get
            # a lane-dense (1, tile) output row (trans_b matmul -> unmasked vst).
            row = lax.dot_general(
                w, h.astype(w.dtype),
                dimension_numbers=(((1,), (1,)), ((), ())),
                preferred_element_type=jnp.float32) + b
            o_ref[...] = row.reshape(o_ref.shape).astype(o_ref.dtype)
        else:
            out = jnp.dot(h.astype(w.dtype), w,
                          preferred_element_type=jnp.float32) + b
            o_ref[...] = out.astype(o_ref.dtype)

    return kernel


def _choose_batch_tiling(B, batch_tile, min_split_rows):
    """Balanced batch tiling.

    Single grid step for small batches; otherwise >=2 steps (so v7x's two
    TensorCores both get work) with tile = round_up(cdiv(B, steps), 8) so
    padding waste is bounded by a few rows per step.
    """
    if B <= min(min_split_rows, batch_tile):
        return max(_SUBLANE, _round_up(B, _SUBLANE)), 1
    num_steps = max(2, pl.cdiv(B, batch_tile))
    tile = _round_up(pl.cdiv(B, num_steps), _SUBLANE)
    return tile, num_steps


def encoder_forward(x, params: EncoderParams, *, batch_tile=2048,
                    min_split_rows=256):
    """Run the Encoder MLP forward pass as a single Pallas kernel.

    Args:
      x:      (B, input_dim) float32
      params: EncoderParams from prepare_encoder_params (padded once).
    Returns:
      (B, output_dim) float32
    """
    B, in_dim = x.shape
    assert in_dim == params.in_dim, "input feature dim mismatch"
    num_layers = len(params.weights)
    out_dim = params.out_dim

    tile, num_steps = _choose_batch_tiling(B, batch_tile, min_split_rows)
    B_pad = tile * num_steps

    # Only batch-row padding, and only when actually needed (x is never
    # feature-padded: the BlockSpec last dim equals the full array dim).
    x_p = x if B_pad == B else jnp.zeros((B_pad, in_dim), x.dtype).at[:B].set(x)

    in_specs = [pl.BlockSpec((tile, in_dim), lambda i: (i, 0))]
    args = [x_p]
    for w, b in zip(params.weights, params.biases):
        # Constant block index -> weights/biases stay resident in VMEM.
        in_specs.append(pl.BlockSpec(w.shape, lambda i: (0, 0)))
        in_specs.append(pl.BlockSpec(b.shape, lambda i: (0, 0)))
        args.append(w)
        args.append(b)
    # TODO(synk): for very wide hidden layers on v7x, single-buffer the resident
    # weights (pipeline_mode=pl.Buffered(1)) to halve their VMEM footprint.

    if params.transposed_out:
        out_shape = jax.ShapeDtypeStruct((num_steps, 1, tile), x.dtype)
        out_spec = pl.BlockSpec((1, 1, tile), lambda i: (i, 0, 0))
        out_bytes_total = B_pad * 4
        out_block_bytes = tile * 4
    else:
        out_pad = params.weights[-1].shape[1]
        out_shape = jax.ShapeDtypeStruct((B_pad, out_pad), x.dtype)
        out_spec = pl.BlockSpec((tile, out_pad), lambda i: (i, 0))
        out_bytes_total = B_pad * out_pad * 4
        out_block_bytes = tile * out_pad * 4

    param_bytes = sum(int(a.size) * a.dtype.itemsize
                      for a in (list(params.weights) + list(params.biases)))
    widest = max([in_dim] + [max(int(w.shape[0]), int(w.shape[1]))
                             for w in params.weights])
    vmem_need = (2 * tile * in_dim * 4        # x tile, double-buffered
                 + 2 * out_block_bytes        # out tile, double-buffered
                 + 2 * param_bytes            # resident params (dbl-buffered)
                 + 4 * tile * widest * 4)     # activation temporaries (generous)
    vmem_limit = int(min(max(vmem_need + (2 << 20), 8 << 20), 32 << 20))

    flops = 2 * B_pad * sum(int(w.size) for w in params.weights)
    bytes_accessed = (int(x_p.size) * x_p.dtype.itemsize
                      + out_bytes_total + param_bytes)
    cost = pl.CostEstimate(flops=flops, transcendentals=0,
                           bytes_accessed=bytes_accessed)

    kernel = _make_mlp_kernel(num_layers, params.transposed_out)

    out_p = pl.pallas_call(
        kernel,
        out_shape=out_shape,
        grid_spec=pltpu.PrefetchScalarGridSpec(
            num_scalar_prefetch=0,
            grid=(num_steps,),
            in_specs=in_specs,
            out_specs=out_spec,
        ),
        compiler_params=pltpu.CompilerParams(
            dimension_semantics=("parallel",),
            vmem_limit_bytes=vmem_limit,
        ),
        cost_estimate=cost,
    )(*args)

    if params.transposed_out:
        return out_p.reshape(-1)[:B].reshape(B, 1)
    return out_p[:B, :out_dim]


def init_encoder_params(key, input_dim, hidden_dim, output_dim, hidden_layers):
    """Deterministic parameter init mirroring Encoder.__init__ / init_weights.

    Weights use orthogonal init (init='ortho'); biases use the default
    nn.Linear uniform(-1/sqrt(fan_in), 1/sqrt(fan_in)) init.
    Returns weights already transposed to (in, out) and biases as (out,).
    """
    dims = [(input_dim, hidden_dim)]
    for _ in range(hidden_layers):
        dims.append((hidden_dim, hidden_dim))
    dims.append((hidden_dim, output_dim))

    ortho = jax.nn.initializers.orthogonal()
    weights, biases = [], []
    for (fan_in, fan_out) in dims:
        key, wk, bk = jax.random.split(key, 3)
        # PyTorch stores weight as (out, in); orthogonalize there, then transpose.
        w_pt = ortho(wk, (fan_out, fan_in), jnp.float32)
        bound = 1.0 / jnp.sqrt(jnp.float32(fan_in))
        b = jax.random.uniform(bk, (fan_out,), jnp.float32, -bound, bound)
        weights.append(jnp.transpose(w_pt))  # (in, out)
        biases.append(b)
    return weights, biases


def encoder_reference(x, weights, biases):
    """Plain-JAX reference of the same MLP for a correctness check."""
    h = x
    n = len(weights)
    for i, (w, b) in enumerate(zip(weights, biases)):
        h = jnp.dot(h, w, preferred_element_type=jnp.float32) + b
        if i < n - 1:
            h = jnp.maximum(h, 0.0)
    return h


if __name__ == "__main__":
    # Module defaults: input_dim=64, hidden_dim=64, output_dim=1, hidden_layers=1.
    input_dim, hidden_dim, output_dim, hidden_layers = 64, 64, 1, 1
    batch = 16

    key = jax.random.PRNGKey(0)
    key, xk = jax.random.split(key)
    x = jax.random.normal(xk, (batch, input_dim), jnp.float32)

    weights, biases = init_encoder_params(
        key, input_dim, hidden_dim, output_dim, hidden_layers
    )

    # Padding / transposition happens exactly once, outside the forward pass.
    params = prepare_encoder_params(weights, biases)

    out = encoder_forward(x, params)
    out = jax.block_until_ready(out)

    ref = encoder_reference(x, weights, biases)
    assert out.shape == (batch, output_dim)
    assert jnp.allclose(out, ref, atol=1e-4, rtol=1e-4), "mismatch vs reference"

    print("KERNEL_OK")
</pallas_src>

<mosaic_0001>
module attributes {stable_mosaic.version = 11 : i64} {
  func.func @kernel(%arg0: i32, %arg1: memref<16x64xf32, #tpu.memory_space<vmem>>, %arg2: memref<64x128xf32, #tpu.memory_space<vmem>>, %arg3: memref<1x128xf32, #tpu.memory_space<vmem>>, %arg4: memref<128x128xf32, #tpu.memory_space<vmem>>, %arg5: memref<1x128xf32, #tpu.memory_space<vmem>>, %arg6: memref<1x128xf32, #tpu.memory_space<vmem>>, %arg7: memref<1x1xf32, #tpu.memory_space<vmem>>, %arg8: memref<1x1x16xf32, #tpu.memory_space<vmem>>) attributes {dimension_semantics = [#tpu.dimension_semantics<parallel>], iteration_bounds = array<i64: 1>, scalar_prefetch = 0 : i64, scratch_operands = 0 : i64, tpu.core_type = #tpu.core_type<tc>, window_params = [{transform_indices = @transform_0, window_bounds = array<i64: 16, 64>}, {pipeline_mode = #tpu.pipeline_mode<synchronous>, transform_indices = @transform_1, window_bounds = array<i64: 64, 128>}, {pipeline_mode = #tpu.pipeline_mode<synchronous>, transform_indices = @transform_2, window_bounds = array<i64: 1, 128>}, {pipeline_mode = #tpu.pipeline_mode<synchronous>, transform_indices = @transform_3, window_bounds = array<i64: 128, 128>}, {pipeline_mode = #tpu.pipeline_mode<synchronous>, transform_indices = @transform_4, window_bounds = array<i64: 1, 128>}, {pipeline_mode = #tpu.pipeline_mode<synchronous>, transform_indices = @transform_5, window_bounds = array<i64: 1, 128>}, {pipeline_mode = #tpu.pipeline_mode<synchronous>, transform_indices = @transform_6, window_bounds = array<i64: 1, 1>}, {transform_indices = @transform_7, window_bounds = array<i64: 1, 1, 16>}]} {
    %c0 = arith.constant 0 : index
    %c0_0 = arith.constant 0 : index
    %0 = vector.load %arg1[%c0, %c0_0] : memref<16x64xf32, #tpu.memory_space<vmem>>, vector<16x64xf32>
    %c0_1 = arith.constant 0 : index
    %c0_2 = arith.constant 0 : index
    %1 = vector.load %arg2[%c0_1, %c0_2] : memref<64x128xf32, #tpu.memory_space<vmem>>, vector<64x128xf32>
    %c0_3 = arith.constant 0 : index
    %c0_4 = arith.constant 0 : index
    %2 = vector.load %arg3[%c0_3, %c0_4] : memref<1x128xf32, #tpu.memory_space<vmem>>, vector<1x128xf32>
    %cst = arith.constant dense<0.000000e+00> : vector<16x128xf32>
    %3 = tpu.matmul %0, %1, %cst {dimension_numbers = #tpu.dot_dimension_numbers<[1], [0], [0], [1], [0, 0, 1, 1], [], []>} : vector<16x64xf32>, vector<64x128xf32>, vector<16x128xf32> -> vector<16x128xf32>
    %4 = vector.broadcast %2 : vector<1x128xf32> to vector<16x128xf32>
    %5 = arith.addf %3, %4 : vector<16x128xf32>
    %cst_5 = arith.constant 0.000000e+00 : f32
    %6 = vector.broadcast %cst_5 : f32 to vector<16x128xf32>
    %7 = arith.maximumf %5, %6 : vector<16x128xf32>
    %c0_6 = arith.constant 0 : index
    %c0_7 = arith.constant 0 : index
    %8 = vector.load %arg4[%c0_6, %c0_7] : memref<128x128xf32, #tpu.memory_space<vmem>>, vector<128x128xf32>
    %c0_8 = arith.constant 0 : index
    %c0_9 = arith.constant 0 : index
    %9 = vector.load %arg5[%c0_8, %c0_9] : memref<1x128xf32, #tpu.memory_space<vmem>>, vector<1x128xf32>
    %cst_10 = arith.constant dense<0.000000e+00> : vector<16x128xf32>
    %10 = tpu.matmul %7, %8, %cst_10 {dimension_numbers = #tpu.dot_dimension_numbers<[1], [0], [0], [1], [0, 0, 1, 1], [], []>} : vector<16x128xf32>, vector<128x128xf32>, vector<16x128xf32> -> vector<16x128xf32>
    %11 = vector.broadcast %9 : vector<1x128xf32> to vector<16x128xf32>
    %12 = arith.addf %10, %11 : vector<16x128xf32>
    %cst_11 = arith.constant 0.000000e+00 : f32
    %13 = vector.broadcast %cst_11 : f32 to vector<16x128xf32>
    %14 = arith.maximumf %12, %13 : vector<16x128xf32>
    %c0_12 = arith.constant 0 : index
    %c0_13 = arith.constant 0 : index
    %15 = vector.load %arg6[%c0_12, %c0_13] : memref<1x128xf32, #tpu.memory_space<vmem>>, vector<1x128xf32>
    %c0_14 = arith.constant 0 : index
    %c0_15 = arith.constant 0 : index
    %16 = vector.load %arg7[%c0_14, %c0_15] : memref<1x1xf32, #tpu.memory_space<vmem>>, vector<1x1xf32>
    %cst_16 = arith.constant dense<0.000000e+00> : vector<1x16xf32>
    %17 = tpu.matmul %15, %14, %cst_16 {dimension_numbers = #tpu.dot_dimension_numbers<[1], [1], [0], [0], [0, 0, 1, 0], [], []>} : vector<1x128xf32>, vector<16x128xf32>, vector<1x16xf32> -> vector<1x16xf32>
    %18 = vector.broadcast %16 : vector<1x1xf32> to vector<1x16xf32>
    %19 = arith.addf %17, %18 : vector<1x16xf32>
    %20 = vector.shape_cast %19 : vector<1x16xf32> to vector<1x1x16xf32>
    %c0_17 = arith.constant 0 : index
    %c0_18 = arith.constant 0 : index
    %c0_19 = arith.constant 0 : index
    %21 = vector.load %arg8[%c0_17, %c0_18, %c0_19] : memref<1x1x16xf32, #tpu.memory_space<vmem>>, vector<1x1x16xf32>
    tpu.vector_store %arg8[%c0_17, %c0_18, %c0_19], %20 {strides = array<i32>} : memref<1x1x16xf32, #tpu.memory_space<vmem>>, vector<1x1x16xf32>,
    return
  }
  func.func @transform_0(%arg0: i32) -> (i32, i32) {
    %c0_i32 = arith.constant 0 : i32
    %c0_i32_0 = arith.constant 0 : i32
    return %arg0, %c0_i32 : i32, i32
  }
  func.func @transform_1(%arg0: i32) -> (i32, i32) {
    %c0_i32 = arith.constant 0 : i32
    %c0_i32_0 = arith.constant 0 : i32
    %c0_i32_1 = arith.constant 0 : i32
    return %c0_i32, %c0_i32_0 : i32, i32
  }
  func.func @transform_2(%arg0: i32) -> (i32, i32) {
    %c0_i32 = arith.constant 0 : i32
    %c0_i32_0 = arith.constant 0 : i32
    %c0_i32_1 = arith.constant 0 : i32
    return %c0_i32, %c0_i32_0 : i32, i32
  }
  func.func @transform_3(%arg0: i32) -> (i32, i32) {
    %c0_i32 = arith.constant 0 : i32
    %c0_i32_0 = arith.constant 0 : i32
    %c0_i32_1 = arith.constant 0 : i32
    return %c0_i32, %c0_i32_0 : i32, i32
  }
  func.func @transform_4(%arg0: i32) -> (i32, i32) {
    %c0_i32 = arith.constant 0 : i32
    %c0_i32_0 = arith.constant 0 : i32
    %c0_i32_1 = arith.constant 0 : i32
    return %c0_i32, %c0_i32_0 : i32, i32
  }
  func.func @transform_5(%arg0: i32) -> (i32, i32) {
    %c0_i32 = arith.constant 0 : i32
    %c0_i32_0 = arith.constant 0 : i32
    %c0_i32_1 = arith.constant 0 : i32
    return %c0_i32, %c0_i32_0 : i32, i32
  }
  func.func @transform_6(%arg0: i32) -> (i32, i32) {
    %c0_i32 = arith.constant 0 : i32
    %c0_i32_0 = arith.constant 0 : i32
    %c0_i32_1 = arith.constant 0 : i32
    return %c0_i32, %c0_i32_0 : i32, i32
  }
  func.func @transform_7(%arg0: i32) -> (i32, i32, i32) {
    %c0_i32 = arith.constant 0 : i32
    %c0_i32_0 = arith.constant 0 : i32
    %c0_i32_1 = arith.constant 0 : i32
    return %arg0, %c0_i32, %c0_i32_0 : i32, i32, i32
  }
}

</mosaic_0001>

<bundles_post_ra>
// kernel: tpu_custom_call.1
= control target key start
LH: loop header
LB: loop body
LE: loop exit
PB: predicated region body
PF: predicated region fallthrough
CT: control target
= control target key end

     0   :  { %s418_s0 = inlined_call_operand.hbm [shape: f32[16,64], index: 0, kind: input, shape index: {}]   ;;  %s419_s1 = inlined_call_operand.hbm [shape: f32[64,128], index: 1, kind: input, shape index: {}]   ;;  %s420_s2 = inlined_call_operand.vmem [shape: f32[1,128], index: 2, kind: input, shape index: {}]   ;;  %s421_s3 = inlined_call_operand.hbm [shape: f32[128,128], index: 3, kind: input, shape index: {}]   ;;  %s422_s4 = inlined_call_operand.vmem [shape: f32[1,128], index: 4, kind: input, shape index: {}]   ;;  %s423_s5 = inlined_call_operand.vmem [shape: f32[1,128], index: 5, kind: input, shape index: {}]   ;;  %s424_s6 = inlined_call_operand.<no memory space> [shape: f32[1,1], index: 6, kind: input, shape index: {}]   ;;  %s425_s7 = inlined_call_operand.hbm [shape: f32[1,1,16], index: 7, kind: output, shape index: {}]  }
   0x1   :  { %v12_v0 = vstv %s424_s6 }
   0x2   :  { %13 = vst [vmem:[#allocation2] sm:$0x1] %v12_v0 }
   0x3   :  { %14 = vsyncpa [#allocation4], 0 }
   0x4   :  { %15 = vsyncpa [#allocation7], 0 }
   0x5   :  { %16 = vsyncpa [#allocation5], 0  ;;  %s34_s28 = sshll.u32 %s419_s1, 4  ;;  %s345_s29 = smov [#allocation6]   ;;  %s35_s28 = int_to_ptr.hbm [resolvable:$true] %s34_s28 }
   0x6   :  { %s36_s30 = sshll.u32 %s345_s29, 4  ;;  %s21_s10 = sshll.u32 %s418_s0, 4  ;;  %s37_s30 = int_to_ptr.vmem [resolvable:$true] %s36_s30  ;;  %s22_s10 = int_to_ptr.hbm [resolvable:$true] %s21_s10 }
   0x7   :  { %s346_s11 = smov 128   ;;  %s347_s12 = smov 8  }
   0x8   :  { %42 = dma.hbm_to_vmem [thread:$0]  %s35_s28, 1024, %s37_s30, [#allocation7], %s346_s11, %s346_s11, %s347_s12  }
   0x9   :  { %s348_s6 = smov [#allocation3]   ;;  %s49_s16 = sshll.u32 %s421_s3, 4  ;;  %s50_s16 = int_to_ptr.hbm [resolvable:$true] %s49_s16 }
   0xa   :  { %s23_s13 = sshll.u32 %s348_s6, 4  ;;  %s349_s1 = smov [#allocation8]   ;;  %s24_s13 = int_to_ptr.vmem [resolvable:$true] %s23_s13 }
   0xb   :  { %29 = dma.hbm_to_vmem [thread:$0]  %s22_s10, 256, %s24_s13, [#allocation4], %s346_s11, %s346_s11, %s347_s12  }
   0xc   :  { %s51_s17 = sshll.u32 %s349_s1, 4  ;;  %s52_s17 = int_to_ptr.vmem [resolvable:$true] %s51_s17 }
   0xd   :  { %57 = dma.hbm_to_vmem [thread:$0]  %s50_s16, 2048, %s52_s17, [#allocation7], %s346_s11, %s346_s11, %s347_s12  }
   0xe   :  { %339 = dma.done.wait [#allocation4], 256  }
   0xf   :  { %340 = vsyncadd [#allocation4], 4294967040 }
  0x10   :  { %341 = dma.done.wait [#allocation7], 3072  }
  0x11   :  { %342 = vsyncadd [#allocation7], 4294964224  ;;  %v85_v1 = vld [vmem:[#allocation6 + $0x38] sm:$0xff]  ;;  %v84_v2 = vld [vmem:[#allocation6 + $0x30] sm:$0xff]  ;;  %vm90_vm0 = vcmask 523264   ;;  %v350_v35 = vmov 0  }
  0x12   :  { %105 = vmatpush.msra.mxu0 %v85_v1  ;;  %v83_v3 = vld [vmem:[#allocation6 + $0x28] sm:$0xff]  ;;  %v137_v4 = vld [vmem:[#allocation8 + $0x78] sm:$0xff]  ;;  %v136_v5 = vld [vmem:[#allocation8 + $0x70] sm:$0xff]  ;;  %240 = vset.pattern.permute.xlu0 %v350_v35  ;;  %s351_s21 = smov [#allocation9]   ;;  %vm195_vm1 = vcmask 122880  }
  0x13   :  { %v82_v6 = vld [vmem:[#allocation6 + $0x20] sm:$0xff]  ;;  %142 = vmatpush.msra.mxu1 %v137_v4  ;;  %217 = vmatpush.msra.mxu3 %v137_v4  ;;  %v135_v7 = vld [vmem:[#allocation8 + $0x68] sm:$0xff]  ;;  %v81_v8 = vld [vmem:[#allocation6 + $0x18] sm:$0xff]  ;;  %s202_s22 = sshll.u32 %s351_s21, 4  ;;  %s203_s22 = int_to_ptr.vmem [resolvable:$true] %s202_s22 }
  0x14   :  { %106 = vmatpush.msra.mxu0 %v84_v2  ;;  %v134_v9 = vld [vmem:[#allocation8 + $0x60] sm:$0xff]  ;;  %v80_v10 = vld [vmem:[#allocation6 + $0x10] sm:$0xff]  ;;  %v133_v11 = vld [vmem:[#allocation8 + $0x58] sm:$0xff] }
  0x15   :  { %143 = vmatpush.msra.mxu1 %v136_v5  ;;  %218 = vmatpush.msra.mxu3 %v136_v5  ;;  %v79_v12 = vld [vmem:[#allocation6 + $0x8] sm:$0xff]  ;;  %v132_v13 = vld [vmem:[#allocation8 + $0x50] sm:$0xff]  ;;  %v78_v14 = vld [vmem:[#allocation6] sm:$0xff] }
  0x16   :  { %107 = vmatpush.msra.mxu0 %v83_v3  ;;  %v76_v15 = vld [vmem:[#allocation3] sm:$0xff]  ;;  %v131_v16 = vld [vmem:[#allocation8 + $0x48] sm:$0xff]  ;;  %v130_v17 = vld [vmem:[#allocation8 + $0x40] sm:$0xff] }
  0x17   :  { %144 = vmatpush.msra.mxu1 %v135_v7  ;;  %219 = vmatpush.msra.mxu3 %v135_v7  ;;  %v129_v18 = vld [vmem:[#allocation8 + $0x38] sm:$0xff]  ;;  %v128_v19 = vld [vmem:[#allocation8 + $0x30] sm:$0xff]  ;;  %v127_v21 = vld [vmem:[#allocation8 + $0x28] sm:$0xff] }
  0x18   :  { %108 = vmatpush.msra.mxu0 %v82_v6  ;;  %v77_v20 = vld [vmem:[#allocation3 + $0x8] sm:$0xff]  ;;  %v126_v22 = vld [vmem:[#allocation8 + $0x20] sm:$0xff]  ;;  %v124_v24 = vld [vmem:[#allocation8 + $0x10] sm:$0xff] }
  0x19   :  { %145 = vmatpush.msra.mxu1 %v134_v9  ;;  %220 = vmatpush.msra.mxu3 %v134_v9  ;;  %v125_v23 = vld [vmem:[#allocation8 + $0x18] sm:$0xff]  ;;  %v123_v25 = vld [vmem:[#allocation8 + $0x8] sm:$0xff]  ;;  %v122_v26 = vld [vmem:[#allocation8] sm:$0xff] }
  0x1a   :  { %109 = vmatpush.msra.mxu0 %v81_v8  ;;  %v241_v27 = vld [vmem:[%s420_s2] ss:$0 sm:$0xff] }
  0x1b   :  { %146 = vmatpush.msra.mxu1 %v133_v11  ;;  %221 = vmatpush.msra.mxu3 %v133_v11  ;;  %v168_v34 = vld [vmem:[#allocation2] sm:$0x1] }
  0x1c   :  { %110 = vmatpush.msra.mxu0 %v80_v10  ;;  %171 = vperm.xlu0 %240, %v168_v34   ;;  %v242_v36 = vld [vmem:[%s422_s4] ss:$0 sm:$0xff]  ;;  %s204_s4 = sshll.u32 %s425_s7, 4  ;;  %s205_s4 = int_to_ptr.hbm [resolvable:$true] %s204_s4 }
  0x1d   :  { %147 = vmatpush.msra.mxu1 %v132_v13  ;;  %222 = vmatpush.msra.mxu3 %v132_v13  ;;  %v167_v43 = vld [vmem:[%s423_s5] sm:$0x1] }
  0x1e   :  { %111 = vmatpush.msra.mxu0 %v79_v12 }
  0x1f   :  { %148 = vmatpush.msra.mxu1 %v131_v16  ;;  %223 = vmatpush.msra.mxu3 %v131_v16 }
  0x20   :  { %112 = vmatpush.msra.mxu0 %v78_v14 }
  0x21   :  { %215 = vmatmul.msk.f32.vlgmr.msra.gmra.mxu0 %vm90_vm0, %v76_v15  ;;  %149 = vmatpush.msra.mxu1 %v130_v17 }
  0x22   :  { %224 = vmatpush.msra.mxu3 %v130_v17 }
  0x23   :  { %150 = vmatpush.msra.mxu1 %v129_v18 }
  0x24   :  { %225 = vmatpush.msra.mxu3 %v129_v18 }
  0x25   :  { %151 = vmatpush.msra.mxu1 %v128_v19 }
  0x26   :  { %226 = vmatpush.msra.mxu3 %v128_v19 }
  0x27   :  { %152 = vmatpush.msra.mxu1 %v127_v21 }
  0x28   :  { %227 = vmatpush.msra.mxu3 %v127_v21 }
  0x29   :  { %216 = vmatmul.msk.f32.gmra.mxu0 %vm90_vm0, %v77_v20  ;;  %153 = vmatpush.msra.mxu1 %v126_v22 }
  0x2a   :  { %228 = vmatpush.msra.mxu3 %v126_v22 }
  0x2b   :  { %154 = vmatpush.msra.mxu1 %v125_v23 }
  0x2c   :  { %229 = vmatpush.msra.mxu3 %v125_v23 }
  0x2d   :  { %155 = vmatpush.msra.mxu1 %v124_v24 }
  0x2e   :  { %230 = vmatpush.msra.mxu3 %v124_v24 }
  0x2f   :  { %156 = vmatpush.msra.mxu1 %v123_v25 }
  0x30   :  { %231 = vmatpush.msra.mxu3 %v123_v25 }
  0x31   :  { %157 = vmatpush.msra.mxu1 %v122_v26 }
  0x32   :  { %232 = vmatpush.msra.mxu3 %v122_v26 }
  0x8e   :  { %v172_v44 = vpop.permute.xlu0 %171 }
  0x8f   :  { %v174_v45 = vperm.slane %v172_v44, 0 }
  0x9e   :  { %v114_v28 = vpop.f32.mrf.mxu0 }
  0x9f   :  { %v115_v29 = vadd.f32 %v241_v27, %v114_v28 }
  0xa1   :  { %v120_v30 = vmax.f32 %v115_v29, 0.0 }
  0xa3   :  { %158 = vmatmul.f32.vlgmr.msra.gmra.mxu1 %v120_v30 }
  0xa6   :  { %v117_v31 = vpop.f32.mrf.mxu0 }
  0xa7   :  { %v118_v32 = vadd.f32 %v241_v27, %v117_v31 }
  0xa9   :  { %v121_v33 = vmax.f32 %v118_v32, 0.0 }
  0xab   :  { %161 = vmatmul.f32.vlgmr.msra.gmra.mxu3 %v121_v33 }
 0x120   :  { %v159_v37 = vpop.f32.mrf.mxu1 }
 0x121   :  { %v160_v40 = vadd.f32 %v242_v36, %v159_v37 }
 0x123   :  { %v165_v42 = vmax.f32 %v160_v40, 0.0 }
 0x12e   :  { %v162_v38 = vpop.f32.mrf.mxu3 }
 0x12f   :  { %v163_v39 = vadd.f32 %v242_v36, %v162_v38 }
 0x131   :  { %v166_v41 = vmax.f32 %v163_v39, 0.0 }
 0x133   :  { %189 = vmatpush.xpose.msra.mxu2 %v166_v41 }
 0x137   :  { %190 = vmatpush.xpose.msra.mxu2 %v165_v42 }
 0x13a   :  { %191 = vmatmul.f32.vlgmr.msra.gmra.mxu2 %v167_v43 }
 0x1bd   :  { %v192_v46 = vpop.f32.mrf.mxu2 }
 0x1be   :  { %v193_v47 = vadd.f32 %v192_v46, %v174_v45 }
 0x1c0   :  { %196 = vst.msk [vmem:[#allocation9] sm:$0x1] %vm195_vm1, %v193_v47 }
 0x1c1   :  { %207 = dma.vmem_to_hbm [thread:$0]  %s203_s22, 16, %s205_s4, [#allocation5]  }
 0x1c2   :  { %343 = dma.done.wait [#allocation5], 16  }
 0x1c3   :  { %344 = vsyncadd [#allocation5], 4294967280 }
 0x1c4   :  { %212 = vsyncpa [#allocation4], 1 }
 0x1c5   :  { %213 = vsyncpa [#allocation7], 1 }
 0x1c6   :  { %214 = vsyncpa [#allocation5], 1 }

</bundles_post_ra>
